<compile_context>
chip_gen: v5e
topology: v5e:2x2
jax: 0.10.0
libtpu: 0.0.40
codegen_flags: <defaults>
</compile_context>

<pallas_src>
import functools

import jax
import jax.numpy as jnp
from jax.experimental import pallas as pl
from jax.experimental.pallas import tpu as pltpu

_LANE = 128


def _round_up(x, m):
    return ((x + m - 1) // m) * m


def _fused_mlp_kernel(*refs, num_layers):
    """refs = (x_ref, w1, b1, w2, b2, ..., wL, bL, o_ref). Everything in VMEM."""
    x_ref = refs[0]
    o_ref = refs[-1]
    wb = refs[1:-1]

    h = x_ref[...]                                   # bf16 (TM, Kpad)
    for li in range(num_layers):
        w = wb[2 * li][...]                          # bf16 (Kpad, Dpad), VMEM-resident
        b = wb[2 * li + 1][...]                      # f32  (1, Dpad)
        y = jnp.dot(h, w, preferred_element_type=jnp.float32) + b
        if li < num_layers - 1:
            # ReLU (+ eval-mode dropout no-op); recast to bf16 for next MXU pass.
            h = jnp.maximum(y, 0.0).astype(jnp.bfloat16)
        else:
            o_ref[...] = y.astype(o_ref.dtype)       # lane-dense (TM, 128k) store


def node_classifier_forward(x, params, *, row_tile=256):
    """Fused Pallas forward: (Linear -> ReLU -> Dropout[noop]) x (L-1) -> Linear.

    x: (N, input_dim) f32.  params: list of (w, b) with w (d_in, d_out), b (1, d_out).
    Returns (N, num_classes) f32 logits.
    """
    n, d_in = x.shape
    num_layers = len(params)

    # Feature dims of every layer boundary, padded to full 128-lane tiles.
    dims = [d_in] + [w.shape[1] for w, _ in params]
    pdims = [_round_up(d, _LANE) for d in dims]

    # Row tiling: multiples of 8 sublanes; small inputs collapse to one tile.
    tm = min(row_tile, _round_up(n, 8))
    n_pad = _round_up(n, tm)

    # Zero-pad + cast activations/weights to bf16 once (not per grid step).
    x_p = jnp.zeros((n_pad, pdims[0]), jnp.bfloat16)
    x_p = x_p.at[:n, :d_in].set(x.astype(jnp.bfloat16))

    padded_params = []
    for li, (w, b) in enumerate(params):
        w_p = jnp.zeros((pdims[li], pdims[li + 1]), jnp.bfloat16)
        w_p = w_p.at[: w.shape[0], : w.shape[1]].set(w.astype(jnp.bfloat16))
        b_p = jnp.zeros((1, pdims[li + 1]), jnp.float32)
        b_p = b_p.at[:, : b.shape[1]].set(b.astype(jnp.float32))
        padded_params += [w_p, b_p]

    grid = (n_pad // tm,)

    in_specs = [pl.BlockSpec((tm, pdims[0]), lambda i: (i, 0))]     # x row tile
    for li in range(num_layers):
        # Constant index maps -> weights/biases DMA'd once, VMEM-resident.
        in_specs.append(pl.BlockSpec((pdims[li], pdims[li + 1]), lambda i: (0, 0)))
        in_specs.append(pl.BlockSpec((1, pdims[li + 1]), lambda i: (0, 0)))
    out_specs = pl.BlockSpec((tm, pdims[-1]), lambda i: (i, 0))

    kernel = functools.partial(_fused_mlp_kernel, num_layers=num_layers)
    out_padded = pl.pallas_call(
        kernel,
        out_shape=jax.ShapeDtypeStruct((n_pad, pdims[-1]), jnp.float32),
        grid=grid,
        in_specs=in_specs,
        out_specs=out_specs,
        compiler_params=pltpu.CompilerParams(
            dimension_semantics=("parallel",),      # shards row tiles on v7x's 2 TCs
        ),
    )(x_p, *padded_params)

    # Slice away row padding and the zero-padded class lanes.
    return out_padded[:n, : dims[-1]]


def init_node_classifier_params(key, input_dim, hidden_dim, num_classes,
                                num_layers=2):
    """Deterministic init mirroring nn.Linear's U(-1/sqrt(fan_in), +...)."""
    params = []
    d_in = input_dim
    for _ in range(num_layers - 1):
        key, kw, kb = jax.random.split(key, 3)
        bound = 1.0 / jnp.sqrt(jnp.float32(d_in))
        w = jax.random.uniform(kw, (d_in, hidden_dim), jnp.float32,
                               -bound, bound)       # stored as (in, out)
        b = jax.random.uniform(kb, (1, hidden_dim), jnp.float32, -bound, bound)
        params.append((w, b))
        d_in = hidden_dim
    key, kw, kb = jax.random.split(key, 3)
    bound = 1.0 / jnp.sqrt(jnp.float32(hidden_dim))
    w = jax.random.uniform(kw, (hidden_dim, num_classes), jnp.float32,
                           -bound, bound)
    b = jax.random.uniform(kb, (1, num_classes), jnp.float32, -bound, bound)
    params.append((w, b))
    return params


def node_classifier_reference(x, params):
    """Pure-JAX reference with matching bf16-matmul / f32-accumulate numerics."""
    h = x
    for w, b in params[:-1]:
        y = jnp.dot(h.astype(jnp.bfloat16), w.astype(jnp.bfloat16),
                    preferred_element_type=jnp.float32) + b
        h = jnp.maximum(y, 0.0)
    w, b = params[-1]
    return jnp.dot(h.astype(jnp.bfloat16), w.astype(jnp.bfloat16),
                   preferred_element_type=jnp.float32) + b


if __name__ == "__main__":
    # Small, module-consistent shapes: 16 nodes, input_dim=32, hidden=32, 8 classes.
    N, INPUT_DIM, HIDDEN_DIM, NUM_CLASSES, NUM_LAYERS = 16, 32, 32, 8, 2

    key = jax.random.PRNGKey(0)
    key, kx = jax.random.split(key)
    x = jax.random.normal(kx, (N, INPUT_DIM), dtype=jnp.float32)

    params = init_node_classifier_params(
        key, INPUT_DIM, HIDDEN_DIM, NUM_CLASSES, NUM_LAYERS)

    out = node_classifier_forward(x, params)
    out = jax.block_until_ready(out)

    ref = node_classifier_reference(x, params)
    assert out.shape == (N, NUM_CLASSES)
    assert jnp.allclose(out, ref, atol=2e-2, rtol=2e-2), "mismatch vs reference"

    print("KERNEL_OK")
</pallas_src>

<mosaic_0001>
module attributes {stable_mosaic.version = 11 : i64} {
  func.func @_fused_mlp_kernel(%arg0: i32, %arg1: memref<16x128xbf16, #tpu.memory_space<vmem>>, %arg2: memref<128x128xbf16, #tpu.memory_space<vmem>>, %arg3: memref<1x128xf32, #tpu.memory_space<vmem>>, %arg4: memref<128x128xbf16, #tpu.memory_space<vmem>>, %arg5: memref<1x128xf32, #tpu.memory_space<vmem>>, %arg6: memref<16x128xf32, #tpu.memory_space<vmem>>) attributes {dimension_semantics = [#tpu.dimension_semantics<parallel>], iteration_bounds = array<i64: 1>, scalar_prefetch = 0 : i64, scratch_operands = 0 : i64, tpu.core_type = #tpu.core_type<tc>, window_params = [{transform_indices = @transform_0, window_bounds = array<i64: 16, 128>}, {pipeline_mode = #tpu.pipeline_mode<synchronous>, transform_indices = @transform_1, window_bounds = array<i64: 128, 128>}, {pipeline_mode = #tpu.pipeline_mode<synchronous>, transform_indices = @transform_2, window_bounds = array<i64: 1, 128>}, {pipeline_mode = #tpu.pipeline_mode<synchronous>, transform_indices = @transform_3, window_bounds = array<i64: 128, 128>}, {pipeline_mode = #tpu.pipeline_mode<synchronous>, transform_indices = @transform_4, window_bounds = array<i64: 1, 128>}, {transform_indices = @transform_5, window_bounds = array<i64: 16, 128>}]} {
    %c0 = arith.constant 0 : index
    %c0_0 = arith.constant 0 : index
    %0 = vector.load %arg1[%c0, %c0_0] : memref<16x128xbf16, #tpu.memory_space<vmem>>, vector<16x128xbf16>
    %c0_1 = arith.constant 0 : index
    %c0_2 = arith.constant 0 : index
    %1 = vector.load %arg2[%c0_1, %c0_2] : memref<128x128xbf16, #tpu.memory_space<vmem>>, vector<128x128xbf16>
    %c0_3 = arith.constant 0 : index
    %c0_4 = arith.constant 0 : index
    %2 = vector.load %arg3[%c0_3, %c0_4] : memref<1x128xf32, #tpu.memory_space<vmem>>, vector<1x128xf32>
    %cst = arith.constant dense<0.000000e+00> : vector<16x128xf32>
    %3 = tpu.matmul %0, %1, %cst {dimension_numbers = #tpu.dot_dimension_numbers<[1], [0], [0], [1], [0, 0, 1, 1], [], []>} : vector<16x128xbf16>, vector<128x128xbf16>, vector<16x128xf32> -> vector<16x128xf32>
    %4 = vector.broadcast %2 : vector<1x128xf32> to vector<16x128xf32>
    %5 = arith.addf %3, %4 : vector<16x128xf32>
    %cst_5 = arith.constant 0.000000e+00 : f32
    %6 = vector.broadcast %cst_5 : f32 to vector<16x128xf32>
    %7 = arith.maximumf %5, %6 : vector<16x128xf32>
    %8 = arith.truncf %7 : vector<16x128xf32> to vector<16x128xbf16>
    %c0_6 = arith.constant 0 : index
    %c0_7 = arith.constant 0 : index
    %9 = vector.load %arg4[%c0_6, %c0_7] : memref<128x128xbf16, #tpu.memory_space<vmem>>, vector<128x128xbf16>
    %c0_8 = arith.constant 0 : index
    %c0_9 = arith.constant 0 : index
    %10 = vector.load %arg5[%c0_8, %c0_9] : memref<1x128xf32, #tpu.memory_space<vmem>>, vector<1x128xf32>
    %cst_10 = arith.constant dense<0.000000e+00> : vector<16x128xf32>
    %11 = tpu.matmul %8, %9, %cst_10 {dimension_numbers = #tpu.dot_dimension_numbers<[1], [0], [0], [1], [0, 0, 1, 1], [], []>} : vector<16x128xbf16>, vector<128x128xbf16>, vector<16x128xf32> -> vector<16x128xf32>
    %12 = vector.broadcast %10 : vector<1x128xf32> to vector<16x128xf32>
    %13 = arith.addf %11, %12 : vector<16x128xf32>
    %c0_11 = arith.constant 0 : index
    %c0_12 = arith.constant 0 : index
    %14 = vector.load %arg6[%c0_11, %c0_12] : memref<16x128xf32, #tpu.memory_space<vmem>>, vector<16x128xf32>
    tpu.vector_store %arg6[%c0_11, %c0_12], %13 {strides = array<i32>} : memref<16x128xf32, #tpu.memory_space<vmem>>, vector<16x128xf32>,
    return
  }
  func.func @transform_0(%arg0: i32) -> (i32, i32) {
    %c0_i32 = arith.constant 0 : i32
    %c0_i32_0 = arith.constant 0 : i32
    return %arg0, %c0_i32 : i32, i32
  }
  func.func @transform_1(%arg0: i32) -> (i32, i32) {
    %c0_i32 = arith.constant 0 : i32
    %c0_i32_0 = arith.constant 0 : i32
    %c0_i32_1 = arith.constant 0 : i32
    return %c0_i32, %c0_i32_0 : i32, i32
  }
  func.func @transform_2(%arg0: i32) -> (i32, i32) {
    %c0_i32 = arith.constant 0 : i32
    %c0_i32_0 = arith.constant 0 : i32
    %c0_i32_1 = arith.constant 0 : i32
    return %c0_i32, %c0_i32_0 : i32, i32
  }
  func.func @transform_3(%arg0: i32) -> (i32, i32) {
    %c0_i32 = arith.constant 0 : i32
    %c0_i32_0 = arith.constant 0 : i32
    %c0_i32_1 = arith.constant 0 : i32
    return %c0_i32, %c0_i32_0 : i32, i32
  }
  func.func @transform_4(%arg0: i32) -> (i32, i32) {
    %c0_i32 = arith.constant 0 : i32
    %c0_i32_0 = arith.constant 0 : i32
    %c0_i32_1 = arith.constant 0 : i32
    return %c0_i32, %c0_i32_0 : i32, i32
  }
  func.func @transform_5(%arg0: i32) -> (i32, i32) {
    %c0_i32 = arith.constant 0 : i32
    %c0_i32_0 = arith.constant 0 : i32
    return %arg0, %c0_i32 : i32, i32
  }
}

</mosaic_0001>

<bundles_post_ra>
// kernel: tpu_custom_call.1
= control target key start
LH: loop header
LB: loop body
LE: loop exit
PB: predicated region body
PF: predicated region fallthrough
CT: control target
= control target key end

     0   :  { %10 = vsyncpa [#allocation3], 0  ;;  %s518_s0 = inlined_call_operand.hbm [shape: bf16[16,128], index: 0, kind: input, shape index: {}]   ;;  %s519_s1 = inlined_call_operand.hbm [shape: bf16[128,128], index: 1, kind: input, shape index: {}]   ;;  %s520_s2 = inlined_call_operand.vmem [shape: f32[1,128], index: 2, kind: input, shape index: {}]   ;;  %s521_s3 = inlined_call_operand.hbm [shape: bf16[128,128], index: 3, kind: input, shape index: {}]   ;;  %s522_s4 = inlined_call_operand.vmem [shape: f32[1,128], index: 4, kind: input, shape index: {}]   ;;  %s523_s5 = inlined_call_operand.hbm [shape: f32[16,128], index: 5, kind: output, shape index: {}]  }
   0x1   :  { %11 = vsyncpa [#allocation6], 0 }
   0x2   :  { %12 = vsyncpa [#allocation4], 0  ;;  %s30_s20 = sshll.u32 %s519_s1, 4  ;;  %s462_s21 = smov [#allocation5]   ;;  %s31_s20 = int_to_ptr.hbm [resolvable:$true] %s30_s20 }
   0x3   :  { %s32_s22 = sshll.u32 %s462_s21, 4  ;;  %s17_s25 = sshll.u32 %s518_s0, 4  ;;  %s33_s22 = int_to_ptr.vmem [resolvable:$true] %s32_s22  ;;  %s18_s25 = int_to_ptr.hbm [resolvable:$true] %s17_s25 }
   0x4   :  { %s463_s26 = smov 64   ;;  %s464_s27 = smov 4  }
   0x5   :  { %38 = dma.hbm_to_vmem [thread:$0]  %s31_s20, 1024, %s33_s22, [#allocation6], %s463_s26, %s463_s26, %s464_s27  }
   0x6   :  { %s465_s28 = smov [#allocation2]   ;;  %s45_s7 = sshll.u32 %s521_s3, 4  ;;  %s46_s7 = int_to_ptr.hbm [resolvable:$true] %s45_s7 }
   0x7   :  { %s19_s29 = sshll.u32 %s465_s28, 4  ;;  %s466_s1 = smov [#allocation7]   ;;  %s20_s29 = int_to_ptr.vmem [resolvable:$true] %s19_s29 }
   0x8   :  { %25 = dma.hbm_to_vmem [thread:$0]  %s18_s25, 128, %s20_s29, [#allocation3], %s463_s26, %s463_s26, %s464_s27  }
   0x9   :  { %s47_s8 = sshll.u32 %s466_s1, 4  ;;  %s48_s8 = int_to_ptr.vmem [resolvable:$true] %s47_s8 }
   0xa   :  { %53 = dma.hbm_to_vmem [thread:$0]  %s46_s7, 1024, %s48_s8, [#allocation6], %s463_s26, %s463_s26, %s464_s27  }
   0xb   :  { %456 = dma.done.wait [#allocation3], 128  }
   0xc   :  { %457 = vsyncadd [#allocation3], 4294967168 }
   0xd   :  { %458 = dma.done.wait [#allocation6], 2048  }
   0xe   :  { %459 = vsyncadd [#allocation6], 4294965248  ;;  %v341_v0 = vld [vmem:[#allocation5 + $0x38] sm:$0xff]  ;;  %v340_v1 = vld [vmem:[#allocation5 + $0x30] sm:$0xff]  ;;  %s467_s11 = smov [#allocation8]   ;;  %s468_s15 = smov 128  }
   0xf   :  { %144 = vmatpush.bf16.msra.mxu0 %v341_v0  ;;  %v349_v2 = vld [vmem:[#allocation7 + $0x38] sm:$0xff]  ;;  %v348_v3 = vld [vmem:[#allocation7 + $0x30] sm:$0xff]  ;;  %v339_v4 = vld [vmem:[#allocation5 + $0x28] sm:$0xff]  ;;  %s249_s12 = sshll.u32 %s467_s11, 4  ;;  %s469_s16 = smov 8   ;;  %s250_s12 = int_to_ptr.vmem [resolvable:$true] %s249_s12 }
  0x10   :  { %229 = vmatpush.bf16.msra.mxu1 %v349_v2  ;;  %v347_v5 = vld [vmem:[#allocation7 + $0x28] sm:$0xff]  ;;  %v338_v6 = vld [vmem:[#allocation5 + $0x20] sm:$0xff]  ;;  %v337_v8 = vld [vmem:[#allocation5 + $0x18] sm:$0xff] }
  0x11   :  { %v346_v7 = vld [vmem:[#allocation7 + $0x20] sm:$0xff]  ;;  %v336_v9 = vld [vmem:[#allocation5 + $0x10] sm:$0xff]  ;;  %v335_v10 = vld [vmem:[#allocation5 + $0x8] sm:$0xff] }
  0x12   :  { %v334_v11 = vld [vmem:[#allocation5] sm:$0xff]  ;;  %v333_v12 = vld [vmem:[#allocation2] sm:$0xff]  ;;  %v344_v14 = vld [vmem:[#allocation7 + $0x10] sm:$0xff] }
  0x13   :  { %145 = vmatpush.bf16.msra.mxu0 %v340_v1  ;;  %v345_v13 = vld [vmem:[#allocation7 + $0x18] sm:$0xff]  ;;  %v343_v15 = vld [vmem:[#allocation7 + $0x8] sm:$0xff]  ;;  %v342_v16 = vld [vmem:[#allocation7] sm:$0xff] }
  0x14   :  { %230 = vmatpush.bf16.msra.mxu1 %v348_v3  ;;  %v358_v18 = vld [vmem:[%s520_s2] ss:$0 sm:$0xff]  ;;  %s251_s2 = sshll.u32 %s523_s5, 4  ;;  %s252_s2 = int_to_ptr.hbm [resolvable:$true] %s251_s2 }
  0x15   :  { %v359_v25 = vld [vmem:[%s522_s4] ss:$0 sm:$0xff] }
  0x17   :  { %146 = vmatpush.bf16.msra.mxu0 %v339_v4 }
  0x18   :  { %231 = vmatpush.bf16.msra.mxu1 %v347_v5 }
  0x1b   :  { %147 = vmatpush.bf16.msra.mxu0 %v338_v6 }
  0x1c   :  { %232 = vmatpush.bf16.msra.mxu1 %v346_v7 }
  0x1f   :  { %148 = vmatpush.bf16.msra.mxu0 %v337_v8 }
  0x20   :  { %233 = vmatpush.bf16.msra.mxu1 %v345_v13 }
  0x23   :  { %149 = vmatpush.bf16.msra.mxu0 %v336_v9 }
  0x24   :  { %234 = vmatpush.bf16.msra.mxu1 %v344_v14 }
  0x27   :  { %150 = vmatpush.bf16.msra.mxu0 %v335_v10 }
  0x28   :  { %235 = vmatpush.bf16.msra.mxu1 %v343_v15 }
  0x2b   :  { %151 = vmatpush.bf16.msra.mxu0 %v334_v11 }
  0x2c   :  { %236 = vmatpush.bf16.msra.mxu1 %v342_v16 }
  0x2e   :  { %152 = vmatmul.bf16.vlgmr.msra.gmra.mxu0 %v333_v12 }
  0xab   :  { %v153_v17 = vpop.f32.mrf.mxu0 }
  0xac   :  { %v154_v19 = vadd.f32 %v358_v18, %v153_v17 }
  0xae   :  { %v158_v22 = vmax.f32 %v154_v19, 0.0 }
  0xb3   :  { %v155_v20 = vpop.f32.mrf.mxu0 }
  0xb4   :  { %v156_v21 = vadd.f32 %v358_v18, %v155_v20 }
  0xb6   :  { %v159_v23 = vmax.f32 %v156_v21, 0.0 }
  0xb8   :  { %v160_v24 = vpack.c.bf16 %v159_v23, %v158_v22 }
  0xba   :  { %237 = vmatmul.bf16.vlgmr.msra.gmra.mxu1 %v160_v24 }
 0x137   :  { %v238_v26 = vpop.f32.mrf.mxu1 }
 0x138   :  { %v239_v27 = vadd.f32 %v359_v25, %v238_v26 }
 0x13a   :  { %243 = vst [vmem:[#allocation8] sm:$0xff] %v239_v27 }
 0x13f   :  { %v240_v28 = vpop.f32.mrf.mxu1 }
 0x140   :  { %v241_v29 = vadd.f32 %v359_v25, %v240_v28 }
 0x142   :  { %244 = vst [vmem:[#allocation8 + $0x8] sm:$0xff] %v241_v29 }
 0x143   :  { %257 = dma.vmem_to_hbm [thread:$0]  %s250_s12, 256, %s252_s2, [#allocation4], %s468_s15, %s468_s15, %s469_s16  }
 0x144   :  { %460 = dma.done.wait [#allocation4], 256  }
 0x145   :  { %461 = vsyncadd [#allocation4], 4294967040 }
 0x146   :  { %262 = vsyncpa [#allocation3], 1 }
 0x147   :  { %263 = vsyncpa [#allocation6], 1 }
 0x148   :  { %264 = vsyncpa [#allocation4], 1 }

</bundles_post_ra>
